<compile_context>
chip_gen: v5e
topology: v5e:2x2
jax: 0.10.0
libtpu: 0.0.40
codegen_flags: <defaults>
</compile_context>

<pallas_src>
import math

import jax
import jax.numpy as jnp
from jax import lax
from jax.experimental import pallas as pl
from jax.experimental.pallas import tpu as pltpu

D_MODEL = 64
INPUT_DIM = 512
SEQ = 10          # sequence length of query
SEQ_K = 10        # sequence length of key
BATCH = 2         # small batch to exercise the batch grid / megacore sharding


def make_params(rng):
    """PyTorch nn.Linear-style deterministic init: U(-1/sqrt(fan_in), 1/sqrt(fan_in))."""
    def linear(rng, fan_in, fan_out):
        kw, kb = jax.random.split(rng)
        bound = 1.0 / math.sqrt(fan_in)
        w = jax.random.uniform(kw, (fan_in, fan_out), jnp.float32, -bound, bound)
        b = jax.random.uniform(kb, (1, fan_out), jnp.float32, -bound, bound)
        return w, b

    r = jax.random.split(rng, 4)
    wq, bq = linear(r[0], INPUT_DIM, D_MODEL)
    wk, bk = linear(r[1], INPUT_DIM, D_MODEL)
    wv, bv = linear(r[2], INPUT_DIM, D_MODEL)
    wp, bp = linear(r[3], D_MODEL, D_MODEL)
    return dict(wq=wq, bq=bq, wk=wk, bk=bk, wv=wv, bv=bv, wp=wp, bp=bp)


def prepare_params(params, compute_dtype=jnp.float32):
    """Host-side, one-time weight fusion / padding / scale folding.

    Returns (w_qv, b_qv, w_k_pad, b_k_pad, w_p_pad, b_p) where:
      w_qv   (512, 128) = [ wq / sqrt(d_model) | wv ]       (score scale folded into Q)
      w_k_pad(512, 128) = [ wk | 0 ]                         (padded so no lane slicing)
      w_p_pad(128,  64) = [ 0 ; wp ]                         (so qv @ w_p_pad == V @ wp)
    Projection weights are cast to `compute_dtype` (bf16 on v6e/v7x fast path);
    biases and the small output-projection weight stay fp32.
    """
    scale = jnp.float32(1.0 / math.sqrt(D_MODEL))
    w_qv = jnp.concatenate([params["wq"] * scale, params["wv"]], axis=1)
    b_qv = jnp.concatenate([params["bq"] * scale, params["bv"]], axis=1)
    w_k = jnp.concatenate(
        [params["wk"], jnp.zeros((INPUT_DIM, D_MODEL), jnp.float32)], axis=1)
    b_k = jnp.concatenate(
        [params["bk"], jnp.zeros((1, D_MODEL), jnp.float32)], axis=1)
    w_p = jnp.concatenate(
        [jnp.zeros((D_MODEL, D_MODEL), jnp.float32), params["wp"]], axis=0)
    b_p = params["bp"]
    return (w_qv.astype(compute_dtype), b_qv,
            w_k.astype(compute_dtype), b_k,
            w_p, b_p)


def _make_kernel(return_alphas: bool, approx_recip: bool):
    def kernel(q_in_ref, k_in_ref,
               w_qv_ref, b_qv_ref, w_k_ref, b_k_ref, w_p_ref, b_p_ref,
               *out_refs):
        cdt = w_qv_ref.dtype
        q_in = q_in_ref[...].astype(cdt)          # (S, 512)
        k_in = k_in_ref[...].astype(cdt)          # (Sk, 512)

        # Fused [Q*scale | V] projection: one N=128 MXU pass (fp32 accumulation).
        qv = jnp.dot(q_in, w_qv_ref[...],
                     preferred_element_type=jnp.float32) + b_qv_ref[...]      # (S, 128)
        # K projection, zero-padded to N=128 so no lane slicing is needed downstream.
        kp = jnp.dot(k_in, w_k_ref[...],
                     preferred_element_type=jnp.float32) + b_k_ref[...]       # (Sk, 128)

        # scores = (Q/sqrt(d)) @ K^T without materializing a transpose: contract last dims.
        # The zero-padded half of `kp` contributes exact zeros.
        scores = lax.dot_general(
            qv, kp, dimension_numbers=(((1,), (1,)), ((), ())),
            preferred_element_type=jnp.float32)                               # (S, Sk)
        # TODO(synk): mask is None in the reference call; masked_fill(mask==0, -1e9) omitted.

        # Numerically-stable softmax along the last axis.
        m = jnp.max(scores, axis=-1, keepdims=True)
        e = jnp.exp(scores - m)
        denom = jnp.sum(e, axis=-1, keepdims=True)
        alphas = e * pl.reciprocal(denom, approx=approx_recip)

        # out = alphas @ (V @ Wp) + bp.  Rows 0..63 of w_p are zero, so qv @ w_p == V @ Wp.
        vp = jnp.dot(qv, w_p_ref[...], preferred_element_type=jnp.float32)    # (S, 64)
        out = jnp.dot(alphas, vp, preferred_element_type=jnp.float32) + b_p_ref[...]

        out_refs[0][...] = out.astype(out_refs[0].dtype)
        if return_alphas:
            out_refs[1][...] = alphas.astype(out_refs[1].dtype)

    return kernel


def attention_forward(query, key, prep, *, return_alphas=False, approx_recip=True):
    B, S, _ = query.shape
    Sk = key.shape[1]

    kernel = _make_kernel(return_alphas, approx_recip)
    wspec = lambda shape: pl.BlockSpec(shape, lambda b: (0, 0))

    out_shape = jax.ShapeDtypeStruct((B, S, D_MODEL), jnp.float32)
    out_spec = pl.BlockSpec((None, S, D_MODEL), lambda b: (b, 0, 0))
    if return_alphas:
        out_shape = (out_shape, jax.ShapeDtypeStruct((B, S, Sk), jnp.float32))
        out_spec = (out_spec, pl.BlockSpec((None, S, Sk), lambda b: (b, 0, 0)))

    flops = B * (2 * S * INPUT_DIM * 2 * D_MODEL        # fused Q|V projection
                 + 2 * Sk * INPUT_DIM * 2 * D_MODEL     # padded K projection
                 + 2 * S * 2 * D_MODEL * Sk             # scores
                 + 2 * S * 2 * D_MODEL * D_MODEL        # V @ Wp
                 + 2 * S * Sk * D_MODEL)                # alphas @ (V @ Wp)
    weight_bytes = sum(int(p.size) * p.dtype.itemsize for p in prep)
    bytes_accessed = (int(query.size) * 4 + int(key.size) * 4 + weight_bytes
                      + B * S * D_MODEL * 4
                      + (B * S * Sk * 4 if return_alphas else 0))
    cost = pl.CostEstimate(flops=flops, transcendentals=B * S * Sk,
                           bytes_accessed=bytes_accessed)

    return pl.pallas_call(
        kernel,
        out_shape=out_shape,
        grid=(B,),
        in_specs=[
            pl.BlockSpec((None, S, INPUT_DIM), lambda b: (b, 0, 0)),    # query
            pl.BlockSpec((None, Sk, INPUT_DIM), lambda b: (b, 0, 0)),   # key
            wspec((INPUT_DIM, 2 * D_MODEL)),                            # w_qv (fused)
            wspec((1, 2 * D_MODEL)),                                    # b_qv (fused)
            wspec((INPUT_DIM, 2 * D_MODEL)),                            # w_k  (padded)
            wspec((1, 2 * D_MODEL)),                                    # b_k  (padded)
            wspec((2 * D_MODEL, D_MODEL)),                              # w_p  (padded)
            wspec((1, D_MODEL)),                                        # b_p
        ],
        out_specs=out_spec,
        compiler_params=pltpu.CompilerParams(
            dimension_semantics=("parallel",)),
        cost_estimate=cost,
    )(query, key, *prep)


def attention_reference(query, key, params):
    Q = query @ params["wq"] + params["bq"]
    K = key @ params["wk"] + params["bk"]
    # NOTE: the PyTorch module computes V from `query` (not from `key`) — reproduced here.
    V = query @ params["wv"] + params["bv"]
    scores = jnp.einsum("bqd,bkd->bqk", Q, K) / jnp.sqrt(jnp.float32(D_MODEL))
    alphas = jax.nn.softmax(scores, axis=-1)
    context = jnp.einsum("bqk,bkd->bqd", alphas, V)
    out = context @ params["wp"] + params["bp"]
    return out, alphas


if __name__ == "__main__":
    root = jax.random.PRNGKey(0)
    k_params, k_query, k_key = jax.random.split(root, 3)

    params = make_params(k_params)
    query = jax.random.normal(k_query, (BATCH, SEQ, INPUT_DIM), jnp.float32)
    key = jax.random.normal(k_key, (BATCH, SEQ_K, INPUT_DIM), jnp.float32)

    ref_out, ref_alphas = attention_reference(query, key, params)

    # 1) Exact fp32 path (alphas requested, exact reciprocal): strict correctness check.
    prep_f32 = prepare_params(params, jnp.float32)
    out, alphas = attention_forward(query, key, prep_f32,
                                    return_alphas=True, approx_recip=False)
    out = jax.block_until_ready(out)
    alphas = jax.block_until_ready(alphas)
    assert out.shape == (BATCH, SEQ, D_MODEL)
    assert alphas.shape == (BATCH, SEQ, SEQ_K)
    assert jnp.allclose(out, ref_out, atol=1e-4, rtol=1e-4)
    assert jnp.allclose(alphas, ref_alphas, atol=1e-5, rtol=1e-5)

    # 2) Fast path: no alphas writeback, EUP approx reciprocal, bf16 MXU passes on v6e/v7x
    #    (fp32 accumulation; fp32 operands kept on v5e and unknown chips).
    kind = jax.devices()[0].device_kind.lower()
    use_bf16 = any(tag in kind for tag in ("v6", "v7", "7x"))
    prep_fast = prepare_params(params, jnp.bfloat16 if use_bf16 else jnp.float32)
    out_fast = attention_forward(query, key, prep_fast,
                                 return_alphas=False, approx_recip=True)
    out_fast = jax.block_until_ready(out_fast)
    tol = 5e-2 if use_bf16 else 5e-3
    assert out_fast.shape == (BATCH, SEQ, D_MODEL)
    assert jnp.allclose(out_fast, ref_out, atol=tol, rtol=tol)

    print("KERNEL_OK")
</pallas_src>

<mosaic_0001>
module attributes {stable_mosaic.version = 11 : i64} {
  func.func @kernel(%arg0: i32, %arg1: memref<1x10x512xf32, #tpu.memory_space<vmem>>, %arg2: memref<1x10x512xf32, #tpu.memory_space<vmem>>, %arg3: memref<512x128xf32, #tpu.memory_space<vmem>>, %arg4: memref<1x128xf32, #tpu.memory_space<vmem>>, %arg5: memref<512x128xf32, #tpu.memory_space<vmem>>, %arg6: memref<1x128xf32, #tpu.memory_space<vmem>>, %arg7: memref<128x64xf32, #tpu.memory_space<vmem>>, %arg8: memref<1x64xf32, #tpu.memory_space<vmem>>, %arg9: memref<1x10x64xf32, #tpu.memory_space<vmem>>, %arg10: memref<1x10x10xf32, #tpu.memory_space<vmem>>) attributes {dimension_semantics = [#tpu.dimension_semantics<parallel>], iteration_bounds = array<i64: 2>, scalar_prefetch = 0 : i64, scratch_operands = 0 : i64, tpu.core_type = #tpu.core_type<tc>, window_params = [{transform_indices = @transform_0, window_bounds = array<i64: 1, 10, 512>}, {transform_indices = @transform_1, window_bounds = array<i64: 1, 10, 512>}, {pipeline_mode = #tpu.pipeline_mode<synchronous>, transform_indices = @transform_2, window_bounds = array<i64: 512, 128>}, {pipeline_mode = #tpu.pipeline_mode<synchronous>, transform_indices = @transform_3, window_bounds = array<i64: 1, 128>}, {pipeline_mode = #tpu.pipeline_mode<synchronous>, transform_indices = @transform_4, window_bounds = array<i64: 512, 128>}, {pipeline_mode = #tpu.pipeline_mode<synchronous>, transform_indices = @transform_5, window_bounds = array<i64: 1, 128>}, {pipeline_mode = #tpu.pipeline_mode<synchronous>, transform_indices = @transform_6, window_bounds = array<i64: 128, 64>}, {pipeline_mode = #tpu.pipeline_mode<synchronous>, transform_indices = @transform_7, window_bounds = array<i64: 1, 64>}, {transform_indices = @transform_8, window_bounds = array<i64: 1, 10, 64>}, {transform_indices = @transform_9, window_bounds = array<i64: 1, 10, 10>}]} {
    %c0 = arith.constant 0 : index
    %c0_0 = arith.constant 0 : index
    %c0_1 = arith.constant 0 : index
    %0 = vector.load %arg1[%c0, %c0_0, %c0_1] : memref<1x10x512xf32, #tpu.memory_space<vmem>>, vector<1x10x512xf32>
    %1 = vector.shape_cast %0 : vector<1x10x512xf32> to vector<10x512xf32>
    %c0_2 = arith.constant 0 : index
    %c0_3 = arith.constant 0 : index
    %c0_4 = arith.constant 0 : index
    %2 = vector.load %arg2[%c0_2, %c0_3, %c0_4] : memref<1x10x512xf32, #tpu.memory_space<vmem>>, vector<1x10x512xf32>
    %3 = vector.shape_cast %2 : vector<1x10x512xf32> to vector<10x512xf32>
    %c0_5 = arith.constant 0 : index
    %c0_6 = arith.constant 0 : index
    %4 = vector.load %arg3[%c0_5, %c0_6] : memref<512x128xf32, #tpu.memory_space<vmem>>, vector<512x128xf32>
    %cst = arith.constant dense<0.000000e+00> : vector<10x128xf32>
    %5 = tpu.matmul %1, %4, %cst {dimension_numbers = #tpu.dot_dimension_numbers<[1], [0], [0], [1], [0, 0, 1, 1], [], []>} : vector<10x512xf32>, vector<512x128xf32>, vector<10x128xf32> -> vector<10x128xf32>
    %c0_7 = arith.constant 0 : index
    %c0_8 = arith.constant 0 : index
    %6 = vector.load %arg4[%c0_7, %c0_8] : memref<1x128xf32, #tpu.memory_space<vmem>>, vector<1x128xf32>
    %7 = vector.broadcast %6 : vector<1x128xf32> to vector<10x128xf32>
    %8 = arith.addf %5, %7 : vector<10x128xf32>
    %c0_9 = arith.constant 0 : index
    %c0_10 = arith.constant 0 : index
    %9 = vector.load %arg5[%c0_9, %c0_10] : memref<512x128xf32, #tpu.memory_space<vmem>>, vector<512x128xf32>
    %cst_11 = arith.constant dense<0.000000e+00> : vector<10x128xf32>
    %10 = tpu.matmul %3, %9, %cst_11 {dimension_numbers = #tpu.dot_dimension_numbers<[1], [0], [0], [1], [0, 0, 1, 1], [], []>} : vector<10x512xf32>, vector<512x128xf32>, vector<10x128xf32> -> vector<10x128xf32>
    %c0_12 = arith.constant 0 : index
    %c0_13 = arith.constant 0 : index
    %11 = vector.load %arg6[%c0_12, %c0_13] : memref<1x128xf32, #tpu.memory_space<vmem>>, vector<1x128xf32>
    %12 = vector.broadcast %11 : vector<1x128xf32> to vector<10x128xf32>
    %13 = arith.addf %10, %12 : vector<10x128xf32>
    %cst_14 = arith.constant dense<0.000000e+00> : vector<10x10xf32>
    %14 = tpu.matmul %8, %13, %cst_14 {dimension_numbers = #tpu.dot_dimension_numbers<[1], [1], [0], [0], [0, 0, 1, 0], [], []>} : vector<10x128xf32>, vector<10x128xf32>, vector<10x10xf32> -> vector<10x10xf32>
    %cst_15 = arith.constant dense<0xFF800000> : vector<10xf32>
    %15 = vector.multi_reduction <maximumf>, %14, %cst_15 [1] : vector<10x10xf32> to vector<10xf32>
    %16 = vector.shape_cast %15 : vector<10xf32> to vector<10x1xf32>
    %17 = vector.broadcast %16 : vector<10x1xf32> to vector<10x10xf32>
    %18 = arith.subf %14, %17 : vector<10x10xf32>
    %19 = math.exp %18 : vector<10x10xf32>
    %cst_16 = arith.constant dense<0.000000e+00> : vector<10xf32>
    %20 = vector.multi_reduction <add>, %19, %cst_16 [1] : vector<10x10xf32> to vector<10xf32>
    %21 = vector.shape_cast %20 : vector<10xf32> to vector<10x1xf32>
    %22 = tpu.reciprocal %21 : vector<10x1xf32> -> vector<10x1xf32>
    %23 = vector.broadcast %22 : vector<10x1xf32> to vector<10x10xf32>
    %24 = arith.mulf %19, %23 : vector<10x10xf32>
    %c0_17 = arith.constant 0 : index
    %c0_18 = arith.constant 0 : index
    %25 = vector.load %arg7[%c0_17, %c0_18] : memref<128x64xf32, #tpu.memory_space<vmem>>, vector<128x64xf32>
    %cst_19 = arith.constant dense<0.000000e+00> : vector<10x64xf32>
    %26 = tpu.matmul %8, %25, %cst_19 {dimension_numbers = #tpu.dot_dimension_numbers<[1], [0], [0], [1], [0, 0, 1, 1], [], []>} : vector<10x128xf32>, vector<128x64xf32>, vector<10x64xf32> -> vector<10x64xf32>
    %cst_20 = arith.constant dense<0.000000e+00> : vector<10x64xf32>
    %27 = tpu.matmul %24, %26, %cst_20 {dimension_numbers = #tpu.dot_dimension_numbers<[1], [0], [0], [1], [0, 0, 1, 1], [], []>} : vector<10x10xf32>, vector<10x64xf32>, vector<10x64xf32> -> vector<10x64xf32>
    %c0_21 = arith.constant 0 : index
    %c0_22 = arith.constant 0 : index
    %28 = vector.load %arg8[%c0_21, %c0_22] : memref<1x64xf32, #tpu.memory_space<vmem>>, vector<1x64xf32>
    %29 = vector.broadcast %28 : vector<1x64xf32> to vector<10x64xf32>
    %30 = arith.addf %27, %29 : vector<10x64xf32>
    %c0_23 = arith.constant 0 : index
    %c0_24 = arith.constant 0 : index
    %c0_25 = arith.constant 0 : index
    %31 = vector.load %arg9[%c0_23, %c0_24, %c0_25] : memref<1x10x64xf32, #tpu.memory_space<vmem>>, vector<1x10x64xf32>
    %32 = vector.shape_cast %31 : vector<1x10x64xf32> to vector<10x64xf32>
    %33 = vector.shape_cast %30 : vector<10x64xf32> to vector<1x10x64xf32>
    tpu.vector_store %arg9[%c0_23, %c0_24, %c0_25], %33 {strides = array<i32>} : memref<1x10x64xf32, #tpu.memory_space<vmem>>, vector<1x10x64xf32>,
    %c0_26 = arith.constant 0 : index
    %c0_27 = arith.constant 0 : index
    %c0_28 = arith.constant 0 : index
    %34 = vector.load %arg10[%c0_26, %c0_27, %c0_28] : memref<1x10x10xf32, #tpu.memory_space<vmem>>, vector<1x10x10xf32>
    %35 = vector.shape_cast %34 : vector<1x10x10xf32> to vector<10x10xf32>
    %36 = vector.shape_cast %24 : vector<10x10xf32> to vector<1x10x10xf32>
    tpu.vector_store %arg10[%c0_26, %c0_27, %c0_28], %36 {strides = array<i32>} : memref<1x10x10xf32, #tpu.memory_space<vmem>>, vector<1x10x10xf32>,
    return
  }
  func.func @transform_0(%arg0: i32) -> (i32, i32, i32) {
    %c0_i32 = arith.constant 0 : i32
    %c0_i32_0 = arith.constant 0 : i32
    %c0_i32_1 = arith.constant 0 : i32
    return %arg0, %c0_i32, %c0_i32_0 : i32, i32, i32
  }
  func.func @transform_1(%arg0: i32) -> (i32, i32, i32) {
    %c0_i32 = arith.constant 0 : i32
    %c0_i32_0 = arith.constant 0 : i32
    %c0_i32_1 = arith.constant 0 : i32
    return %arg0, %c0_i32, %c0_i32_0 : i32, i32, i32
  }
  func.func @transform_2(%arg0: i32) -> (i32, i32) {
    %c0_i32 = arith.constant 0 : i32
    %c0_i32_0 = arith.constant 0 : i32
    %c0_i32_1 = arith.constant 0 : i32
    return %c0_i32, %c0_i32_0 : i32, i32
  }
  func.func @transform_3(%arg0: i32) -> (i32, i32) {
    %c0_i32 = arith.constant 0 : i32
    %c0_i32_0 = arith.constant 0 : i32
    %c0_i32_1 = arith.constant 0 : i32
    return %c0_i32, %c0_i32_0 : i32, i32
  }
  func.func @transform_4(%arg0: i32) -> (i32, i32) {
    %c0_i32 = arith.constant 0 : i32
    %c0_i32_0 = arith.constant 0 : i32
    %c0_i32_1 = arith.constant 0 : i32
    return %c0_i32, %c0_i32_0 : i32, i32
  }
  func.func @transform_5(%arg0: i32) -> (i32, i32) {
    %c0_i32 = arith.constant 0 : i32
    %c0_i32_0 = arith.constant 0 : i32
    %c0_i32_1 = arith.constant 0 : i32
    return %c0_i32, %c0_i32_0 : i32, i32
  }
  func.func @transform_6(%arg0: i32) -> (i32, i32) {
    %c0_i32 = arith.constant 0 : i32
    %c0_i32_0 = arith.constant 0 : i32
    %c0_i32_1 = arith.constant 0 : i32
    return %c0_i32, %c0_i32_0 : i32, i32
  }
  func.func @transform_7(%arg0: i32) -> (i32, i32) {
    %c0_i32 = arith.constant 0 : i32
    %c0_i32_0 = arith.constant 0 : i32
    %c0_i32_1 = arith.constant 0 : i32
    return %c0_i32, %c0_i32_0 : i32, i32
  }
  func.func @transform_8(%arg0: i32) -> (i32, i32, i32) {
    %c0_i32 = arith.constant 0 : i32
    %c0_i32_0 = arith.constant 0 : i32
    %c0_i32_1 = arith.constant 0 : i32
    return %arg0, %c0_i32, %c0_i32_0 : i32, i32, i32
  }
  func.func @transform_9(%arg0: i32) -> (i32, i32, i32) {
    %c0_i32 = arith.constant 0 : i32
    %c0_i32_0 = arith.constant 0 : i32
    %c0_i32_1 = arith.constant 0 : i32
    return %arg0, %c0_i32, %c0_i32_0 : i32, i32, i32
  }
}

</mosaic_0001>

<bundles_post_ra>
// kernel: tpu_custom_call.1
= control target key start
LH: loop header
LB: loop body
LE: loop exit
PB: predicated region body
PF: predicated region fallthrough
CT: control target
= control target key end

     0   :  { %15 = vsyncpa [#allocation3], 0  ;;  %s1153_s30 = smov 0   ;;  %s1471_s0 = inlined_call_operand.vmem [shape: f32[2,10,512], index: 0, kind: input, shape index: {}]   ;;  %s1472_s1 = inlined_call_operand.vmem [shape: f32[2,10,512], index: 1, kind: input, shape index: {}]   ;;  %s1473_s2 = inlined_call_operand.vmem [shape: f32[512,128], index: 2, kind: input, shape index: {}]   ;;  %s1474_s3 = inlined_call_operand.vmem [shape: f32[1,128], index: 3, kind: input, shape index: {}]   ;;  %s1475_s4 = inlined_call_operand.hbm [shape: f32[512,128], index: 4, kind: input, shape index: {}]   ;;  %s1476_s5 = inlined_call_operand.vmem [shape: f32[1,128], index: 5, kind: input, shape index: {}]   ;;  %s1477_s6 = inlined_call_operand.vmem [shape: f32[128,64], index: 6, kind: input, shape index: {}]   ;;  %s1478_s7 = inlined_call_operand.vmem [shape: f32[1,64], index: 7, kind: input, shape index: {}]   ;;  %s1479_s8 = inlined_call_operand.vmem [shape: f32[2,10,64], index: 8, kind: output, shape index: {0}]   ;;  %s1480_s9 = inlined_call_operand.vmem [shape: f32[2,10,10], index: 9, kind: output, shape index: {1}]  }
   0x1 LB: > { %s273_s12 = sshll.u32 %s1475_s4, 4  ;;  %s1162_s13 = sadd.s32 4294967295, %s1098_s30   ;;  %s1098_s30 = sphi %s1153_s30, %s21_s30   ;;  %s274_s12 = int_to_ptr.hbm [resolvable:$true] %s273_s12 }
   0x2   : > { %p988_p0 = scmp.ge.s32.totalorder %s1098_s30, 1  ;;  %p256_p1 = scmp.lt.s32.totalorder %s1098_s30, 3 }
   0x3   : > { %p1034_p2 = scmp.eq.s32.totalorder %s1162_s13, 0  ;;  %s1100_s14 = smov [#allocation2]  }
   0x4   : > { %p257_p3 = pnand %p988_p0, %p256_p1  ;;  %s275_s15 = sshll.u32 %s1100_s14, 4  ;;  %s276_s15 = int_to_ptr.vmem [resolvable:$true] %s275_s15 }
   0x5   : > { %s1101_s16 = smov 128   ;;  %s1102_s17 = smov 8  }
   0x6   : > { %p1030_p4 = pneg %p257_p3  ;;  %316 = sbr.rel (%p257_p3) target bundleno = 764 (0x2fc), region = 52 }
   0x8   : > { %p1031_p5 = pnand %p1034_p2, %p1030_p4 }
   0xa   : > { %1033 = dma.hbm_to_vmem [thread:$0]  (!%p1031_p5), %s274_s12, 8192, %s276_s15, [#allocation3], %s1101_s16, %s1101_s16, %s1102_s17  }
   0xb   : > { %1093 = dma.done.wait (%p1034_p2), [#allocation3], 8192  }
   0xc   : > { %1095 = vsyncadd (%p1034_p2), [#allocation3], 4294959104  ;;  %v446_v0 = vld [vmem:[%s1473_s2 + $0x178] sm:$0xff]  ;;  %v445_v2 = vld [vmem:[%s1473_s2 + $0x170] sm:$0xff]  ;;  %p363_p6 = scmp.lt.s32.totalorder %s1162_s13, 1  ;;  %vm841_vm0 = vcmask 1041408  }
   0xd   : > { %v414_v1 = vld [vmem:[%s1473_s2 + $0x78] sm:$0xff]  ;;  %513 = vmatpush.msra.mxu2 %v446_v0  ;;  %v413_v4 = vld [vmem:[%s1473_s2 + $0x70] sm:$0xff]  ;;  %v444_v6 = vld [vmem:[%s1473_s2 + $0x168] sm:$0xff]  ;;  %vm742_vm1 = vcmask 80896   ;;  %vm746_vm2 = vcmask 74752   ;;  %vm868_vm11 = vcmask 523264  }
   0xe   : > { %467 = vmatpush.msra.mxu0 %v414_v1  ;;  %v462_v3 = vld [vmem:[%s1473_s2 + $0x1f8] sm:$0xff]  ;;  %v461_v7 = vld [vmem:[%s1473_s2 + $0x1f0] sm:$0xff]  ;;  %v412_v8 = vld [vmem:[%s1473_s2 + $0x68] sm:$0xff]  ;;  %s1482_s13 = smov (!%p363_p6, %s1162_s13), 1  ;;  %vm870_vm12 = vcmask 517120  }
   0xf   : > { %v430_v5 = vld [vmem:[%s1473_s2 + $0xf8] sm:$0xff]  ;;  %536 = vmatpush.msra.mxu3 %v462_v3  ;;  %514 = vmatpush.msra.mxu2 %v445_v2  ;;  %v429_v9 = vld [vmem:[%s1473_s2 + $0xf0] sm:$0xff]  ;;  %v460_v10 = vld [vmem:[%s1473_s2 + $0x1e8] sm:$0xff]  ;;  %s1006_s27 = sshll.u32 %s1482_s13, 6  ;;  %s1008_s19 = sshll.u32 %s1482_s13, 4 }
  0x10   : > { %490 = vmatpush.msra.mxu1 %v430_v5  ;;  %468 = vmatpush.msra.mxu0 %v413_v4  ;;  %v443_v11 = vld [vmem:[%s1473_s2 + $0x160] sm:$0xff]  ;;  %v428_v13 = vld [vmem:[%s1473_s2 + $0xe8] sm:$0xff]  ;;  %v442_v16 = vld [vmem:[%s1473_s2 + $0x158] sm:$0xff]  ;;  %s1353_s23 = scalar_lea.vmem %s1471_s0, %s1006_s27  ;;  %s1386_s20 = scalar_lea.vmem %s1472_s1, %s1006_s27 }
  0x11   : > { %537 = vmatpush.msra.mxu3 %v461_v7  ;;  %v411_v12 = vld [vmem:[%s1473_s2 + $0x60] sm:$0xff]  ;;  %515 = vmatpush.msra.mxu2 %v444_v6  ;;  %v410_v17 = vld [vmem:[%s1473_s2 + $0x58] sm:$0xff]  ;;  %v441_v20 = vld [vmem:[%s1473_s2 + $0x150] sm:$0xff]  ;;  %s382_s21 = scalar_lea.vmem %s1480_s9, %s1008_s19  ;;  %s377_s25 = scalar_lea.vmem %s1479_s8, %s1008_s19 }
  0x12   : > { %491 = vmatpush.msra.mxu1 %v429_v9  ;;  %469 = vmatpush.msra.mxu0 %v412_v8  ;;  %v459_v14 = vld [vmem:[%s1473_s2 + $0x1e0] sm:$0xff]  ;;  %v458_v18 = vld [vmem:[%s1473_s2 + $0x1d8] sm:$0xff]  ;;  %v409_v21 = vld [vmem:[%s1473_s2 + $0x50] sm:$0xff] }
  0x13   : > { %v427_v15 = vld [vmem:[%s1473_s2 + $0xe0] sm:$0xff]  ;;  %538 = vmatpush.msra.mxu3 %v460_v10  ;;  %516 = vmatpush.msra.mxu2 %v443_v11  ;;  %v426_v19 = vld [vmem:[%s1473_s2 + $0xd8] sm:$0xff]  ;;  %v457_v22 = vld [vmem:[%s1473_s2 + $0x1d0] sm:$0xff] }
  0x14   : > { %492 = vmatpush.msra.mxu1 %v428_v13  ;;  %470 = vmatpush.msra.mxu0 %v411_v12  ;;  %v425_v23 = vld [vmem:[%s1473_s2 + $0xd0] sm:$0xff]  ;;  %v440_v24 = vld [vmem:[%s1473_s2 + $0x148] sm:$0xff]  ;;  %v439_v28 = vld [vmem:[%s1473_s2 + $0x140] sm:$0xff] }
  0x15   : > { %539 = vmatpush.msra.mxu3 %v459_v14  ;;  %517 = vmatpush.msra.mxu2 %v442_v16  ;;  %v408_v25 = vld [vmem:[%s1473_s2 + $0x48] sm:$0xff]  ;;  %v407_v29 = vld [vmem:[%s1473_s2 + $0x40] sm:$0xff]  ;;  %v438_v32 = vld [vmem:[%s1473_s2 + $0x138] sm:$0xff] }
  0x16   : > { %493 = vmatpush.msra.mxu1 %v427_v15  ;;  %471 = vmatpush.msra.mxu0 %v410_v17  ;;  %v456_v26 = vld [vmem:[%s1473_s2 + $0x1c8] sm:$0xff]  ;;  %v455_v30 = vld [vmem:[%s1473_s2 + $0x1c0] sm:$0xff]  ;;  %v406_v33 = vld [vmem:[%s1473_s2 + $0x38] sm:$0xff] }
  0x17   : > { %540 = vmatpush.msra.mxu3 %v458_v18  ;;  %518 = vmatpush.msra.mxu2 %v441_v20  ;;  %v424_v27 = vld [vmem:[%s1473_s2 + $0xc8] sm:$0xff]  ;;  %v423_v31 = vld [vmem:[%s1473_s2 + $0xc0] sm:$0xff]  ;;  %v454_v34 = vld [vmem:[%s1473_s2 + $0x1b8] sm:$0xff] }
  0x18   : > { %494 = vmatpush.msra.mxu1 %v426_v19  ;;  %472 = vmatpush.msra.mxu0 %v409_v21  ;;  %v422_v35 = vld [vmem:[%s1473_s2 + $0xb8] sm:$0xff]  ;;  %v437_v36 = vld [vmem:[%s1473_s2 + $0x130] sm:$0xff]  ;;  %v436_v40 = vld [vmem:[%s1473_s2 + $0x128] sm:$0xff] }
  0x19   : > { %541 = vmatpush.msra.mxu3 %v457_v22  ;;  %519 = vmatpush.msra.mxu2 %v440_v24  ;;  %v405_v37 = vld [vmem:[%s1473_s2 + $0x30] sm:$0xff]  ;;  %v404_v41 = vld [vmem:[%s1473_s2 + $0x28] sm:$0xff]  ;;  %v435_v44 = vld [vmem:[%s1473_s2 + $0x120] sm:$0xff] }
  0x1a   : > { %495 = vmatpush.msra.mxu1 %v425_v23  ;;  %473 = vmatpush.msra.mxu0 %v408_v25  ;;  %v453_v38 = vld [vmem:[%s1473_s2 + $0x1b0] sm:$0xff]  ;;  %v452_v42 = vld [vmem:[%s1473_s2 + $0x1a8] sm:$0xff]  ;;  %v403_v45 = vld [vmem:[%s1473_s2 + $0x20] sm:$0xff] }
  0x1b   : > { %542 = vmatpush.msra.mxu3 %v456_v26  ;;  %520 = vmatpush.msra.mxu2 %v439_v28  ;;  %v421_v39 = vld [vmem:[%s1473_s2 + $0xb0] sm:$0xff]  ;;  %v420_v43 = vld [vmem:[%s1473_s2 + $0xa8] sm:$0xff]  ;;  %v451_v46 = vld [vmem:[%s1473_s2 + $0x1a0] sm:$0xff] }
  0x1c   : > { %496 = vmatpush.msra.mxu1 %v424_v27  ;;  %474 = vmatpush.msra.mxu0 %v407_v29  ;;  %v419_v47 = vld [vmem:[%s1473_s2 + $0xa0] sm:$0xff]  ;;  %v434_v48 = vld [vmem:[%s1473_s2 + $0x118] sm:$0xff]  ;;  %v433_v52 = vld [vmem:[%s1473_s2 + $0x110] sm:$0xff] }
  0x1d   : > { %543 = vmatpush.msra.mxu3 %v455_v30  ;;  %521 = vmatpush.msra.mxu2 %v438_v32  ;;  %v402_v49 = vld [vmem:[%s1473_s2 + $0x18] sm:$0xff]  ;;  %v401_v53 = vld [vmem:[%s1473_s2 + $0x10] sm:$0xff]  ;;  %v432_v56 = vld [vmem:[%s1473_s2 + $0x108] sm:$0xff] }
  0x1e   : > { %497 = vmatpush.msra.mxu1 %v423_v31  ;;  %475 = vmatpush.msra.mxu0 %v406_v33  ;;  %v450_v50 = vld [vmem:[%s1473_s2 + $0x198] sm:$0xff]  ;;  %v449_v54 = vld [vmem:[%s1473_s2 + $0x190] sm:$0xff]  ;;  %v400_v57 = vld [vmem:[%s1473_s2 + $0x8] sm:$0xff] }
  0x1f   : > { %544 = vmatpush.msra.mxu3 %v454_v34  ;;  %522 = vmatpush.msra.mxu2 %v437_v36  ;;  %v418_v51 = vld [vmem:[%s1473_s2 + $0x98] sm:$0xff]  ;;  %v417_v55 = vld [vmem:[%s1473_s2 + $0x90] sm:$0xff]  ;;  %v448_v58 = vld [vmem:[%s1473_s2 + $0x188] sm:$0xff] }
  0x20   : > { %498 = vmatpush.msra.mxu1 %v422_v35  ;;  %476 = vmatpush.msra.mxu0 %v405_v37  ;;  %v416_v59 = vld [vmem:[%s1473_s2 + $0x88] sm:$0xff]  ;;  %v431_v60 = vld [vmem:[%s1473_s2 + $0x100] sm:$0xff]  ;;  %v385_v62 = vld [vmem:[%s1353_s23 + $0x10] sm:$0xff] }
  0x21   : > { %545 = vmatpush.msra.mxu3 %v453_v38  ;;  %523 = vmatpush.msra.mxu2 %v436_v40  ;;  %v399_v61 = vld [vmem:[%s1473_s2] sm:$0xff]  ;;  %v606_v0 = vld [vmem:[#allocation2 + $0x178] sm:$0xff]  ;;  %v605_v4 = vld [vmem:[#allocation2 + $0x170] sm:$0xff] }
  0x22   : > { %499 = vmatpush.msra.mxu1 %v421_v39  ;;  %477 = vmatpush.msra.mxu0 %v404_v41  ;;  %v447_v63 = vld [vmem:[%s1473_s2 + $0x180] sm:$0xff]  ;;  %v386_v2 = vld [vmem:[%s1353_s23 + $0x18] sm:$0xff]  ;;  %v573_v7 = vld [vmem:[#allocation2 + $0x70] sm:$0xff] }
  0x23   : > { %546 = vmatpush.msra.mxu3 %v452_v42  ;;  %524 = vmatpush.msra.mxu2 %v435_v44  ;;  %v383_v1 = vld [vmem:[%s1353_s23] sm:$0xff]  ;;  %v574_v3 = vld [vmem:[#allocation2 + $0x78] sm:$0xff]  ;;  %v384_v8 = vld [vmem:[%s1353_s23 + $0x8] sm:$0xff] }
  0x24   : > { %500 = vmatpush.msra.mxu1 %v420_v43  ;;  %478 = vmatpush.msra.mxu0 %v403_v45  ;;  %v622_v5 = vld [vmem:[#allocation2 + $0x1f8] sm:$0xff]  ;;  %v415_v6 = vld [vmem:[%s1473_s2 + $0x80] sm:$0xff]  ;;  %v604_v9 = vld [vmem:[#allocation2 + $0x168] sm:$0xff] }
  0x25   : > { %547 = vmatpush.msra.mxu3 %v451_v46  ;;  %525 = vmatpush.msra.mxu2 %v434_v48  ;;  %v590_v10 = vld [vmem:[#allocation2 + $0xf8] sm:$0xff]  ;;  %v621_v11 = vld [vmem:[#allocation2 + $0x1f0] sm:$0xff]  ;;  %v572_v12 = vld [vmem:[#allocation2 + $0x68] sm:$0xff] }
  0x26   : > { %501 = vmatpush.msra.mxu1 %v419_v47  ;;  %479 = vmatpush.msra.mxu0 %v402_v49  ;;  %v603_v13 = vld [vmem:[#allocation2 + $0x160] sm:$0xff]  ;;  %v589_v14 = vld [vmem:[#allocation2 + $0xf0] sm:$0xff]  ;;  %v620_v15 = vld [vmem:[#allocation2 + $0x1e8] sm:$0xff] }
  0x27   : > { %548 = vmatpush.msra.mxu3 %v450_v50  ;;  %526 = vmatpush.msra.mxu2 %v433_v52  ;;  %v389_v16 = vld [vmem:[%s1353_s23 + $0x30] sm:$0x3]  ;;  %v571_v17 = vld [vmem:[#allocation2 + $0x60] sm:$0xff]  ;;  %v588_v18 = vld [vmem:[#allocation2 + $0xe8] sm:$0xff] }
  0x28   : > { %502 = vmatpush.msra.mxu1 %v418_v51  ;;  %480 = vmatpush.msra.mxu0 %v401_v53  ;;  %v602_v19 = vld [vmem:[#allocation2 + $0x158] sm:$0xff]  ;;  %v619_v20 = vld [vmem:[#allocation2 + $0x1e0] sm:$0xff]  ;;  %v601_v25 = vld [vmem:[#allocation2 + $0x150] sm:$0xff] }
  0x29   : > { %549 = vmatpush.msra.mxu3 %v449_v54  ;;  %527 = vmatpush.msra.mxu2 %v432_v56  ;;  %v387_v21 = vld [vmem:[%s1353_s23 + $0x20] sm:$0x3]  ;;  %v390_v22 = vld [vmem:[%s1353_s23 + $0x38] sm:$0x3]  ;;  %v388_v27 = vld [vmem:[%s1353_s23 + $0x28] sm:$0x3] }
  0x2a   : > { %503 = vmatpush.msra.mxu1 %v417_v55  ;;  %481 = vmatpush.msra.mxu0 %v400_v57  ;;  %v570_v23 = vld [vmem:[#allocation2 + $0x58] sm:$0xff]  ;;  %v587_v24 = vld [vmem:[#allocation2 + $0xe0] sm:$0xff]  ;;  %v569_v28 = vld [vmem:[#allocation2 + $0x50] sm:$0xff] }
  0x2b   : > { %550 = vmatpush.msra.mxu3 %v448_v58  ;;  %528 = vmatpush.msra.mxu2 %v431_v60  ;;  %v618_v26 = vld [vmem:[#allocation2 + $0x1d8] sm:$0xff]  ;;  %v600_v30 = vld [vmem:[#allocation2 + $0x148] sm:$0xff]  ;;  %v617_v31 = vld [vmem:[#allocation2 + $0x1d0] sm:$0xff] }
  0x2c   : > { %504 = vmatpush.msra.mxu1 %v416_v59  ;;  %482 = vmatpush.msra.mxu0 %v399_v61  ;;  %v586_v29 = vld [vmem:[#allocation2 + $0xd8] sm:$0xff]  ;;  %v568_v32 = vld [vmem:[#allocation2 + $0x48] sm:$0xff]  ;;  %v585_v33 = vld [vmem:[#allocation2 + $0xd0] sm:$0xff] }
  0x2d   : > { %529 = vmatmul.f32.vlgmr.msra.gmra.mxu2 %v385_v62  ;;  %551 = vmatpush.msra.mxu3 %v447_v63  ;;  %v599_v34 = vld [vmem:[#allocation2 + $0x140] sm:$0xff]  ;;  %v616_v35 = vld [vmem:[#allocation2 + $0x1c8] sm:$0xff]  ;;  %v598_v38 = vld [vmem:[#allocation2 + $0x138] sm:$0xff] }
  0x2e   : > { %673 = vmatpush.msrb.mxu2 %v606_v0  ;;  %483 = vmatmul.f32.vlgmr.msra.gmra.mxu0 %v383_v1  ;;  %v567_v36 = vld [vmem:[#allocation2 + $0x40] sm:$0xff]  ;;  %v584_v37 = vld [vmem:[#allocation2 + $0xc8] sm:$0xff]  ;;  %v566_v40 = vld [vmem:[#allocation2 + $0x38] sm:$0xff] }
  0x2f   : > { %552 = vmatmul.f32.vlgmr.msra.gmra.mxu3 %v386_v2  ;;  %627 = vmatpush.msrb.mxu0 %v574_v3  ;;  %v615_v39 = vld [vmem:[#allocation2 + $0x1c0] sm:$0xff]  ;;  %v597_v42 = vld [vmem:[#allocation2 + $0x130] sm:$0xff]  ;;  %v614_v43 = vld [vmem:[#allocation2 + $0x1b8] sm:$0xff] }
  0x30   : > { %674 = vmatpush.msrb.mxu2 %v605_v4  ;;  %696 = vmatpush.msrb.mxu3 %v622_v5  ;;  %v583_v41 = vld [vmem:[#allocation2 + $0xc0] sm:$0xff]  ;;  %v565_v44 = vld [vmem:[#allocation2 + $0x30] sm:$0xff]  ;;  %v582_v45 = vld [vmem:[#allocation2 + $0xb8] sm:$0xff] }
  0x31   : > { %505 = vmatpush.msra.mxu1 %v415_v6  ;;  %628 = vmatpush.msrb.mxu0 %v573_v7  ;;  %v596_v46 = vld [vmem:[#allocation2 + $0x128] sm:$0xff]  ;;  %v613_v47 = vld [vmem:[#allocation2 + $0x1b0] sm:$0xff]  ;;  %v595_v50 = vld [vmem:[#allocation2 + $0x120] sm:$0xff] }
  0x32   : > { %506 = vmatmul.f32.vlgmr.msra.gmra.mxu1 %v384_v8  ;;  %675 = vmatpush.msrb.mxu2 %v604_v9  ;;  %v564_v48 = vld [vmem:[#allocation2 + $0x28] sm:$0xff]  ;;  %v581_v49 = vld [vmem:[#allocation2 + $0xb0] sm:$0xff]  ;;  %v563_v52 = vld [vmem:[#allocation2 + $0x20] sm:$0xff] }
  0x33   : > { %650 = vmatpush.msrb.mxu1 %v590_v10  ;;  %697 = vmatpush.msrb.mxu3 %v621_v11  ;;  %v612_v51 = vld [vmem:[#allocation2 + $0x1a8] sm:$0xff]  ;;  %v594_v54 = vld [vmem:[#allocation2 + $0x118] sm:$0xff]  ;;  %v611_v55 = vld [vmem:[#allocation2 + $0x1a0] sm:$0xff] }
  0x34   : > { %629 = vmatpush.msrb.mxu0 %v572_v12  ;;  %676 = vmatpush.msrb.mxu2 %v603_v13  ;;  %v580_v53 = vld [vmem:[#allocation2 + $0xa8] sm:$0xff]  ;;  %v562_v56 = vld [vmem:[#allocation2 + $0x18] sm:$0xff]  ;;  %v579_v57 = vld [vmem:[#allocation2 + $0xa0] sm:$0xff] }
  0x35   : > { %651 = vmatpush.msrb.mxu1 %v589_v14  ;;  %698 = vmatpush.msrb.mxu3 %v620_v15  ;;  %v593_v58 = vld [vmem:[#allocation2 + $0x110] sm:$0xff]  ;;  %v610_v59 = vld [vmem:[#allocation2 + $0x198] sm:$0xff]  ;;  %v592_v62 = vld [vmem:[#allocation2 + $0x108] sm:$0xff] }
  0x36   : > { %532 = vmatmul.f32.gmra.mxu2 %v389_v16  ;;  %630 = vmatpush.msrb.mxu0 %v571_v17  ;;  %v561_v60 = vld [vmem:[#allocation2 + $0x10] sm:$0xff]  ;;  %v578_v61 = vld [vmem:[#allocation2 + $0x98] sm:$0xff]  ;;  %v560_v0 = vld [vmem:[#allocation2 + $0x8] sm:$0xff] }
  0x37   : > { %652 = vmatpush.msrb.mxu1 %v588_v18  ;;  %677 = vmatpush.msrb.mxu2 %v602_v19  ;;  %v609_v63 = vld [vmem:[#allocation2 + $0x190] sm:$0xff]  ;;  %v591_v2 = vld [vmem:[#allocation2 + $0x100] sm:$0xff]  ;;  %v608_v3 = vld [vmem:[#allocation2 + $0x188] sm:$0xff] }
  0x38   : > { %699 = vmatpush.msrb.mxu3 %v619_v20  ;;  %486 = vmatmul.f32.gmra.mxu0 %v387_v21  ;;  %v577_v1 = vld [vmem:[#allocation2 + $0x90] sm:$0xff]  ;;  %v559_v5 = vld [vmem:[#allocation2] sm:$0xff]  ;;  %v576_v6 = vld [vmem:[#allocation2 + $0x88] sm:$0xff] }
  0x39   : > { %555 = vmatmul.f32.gmra.mxu3 %v390_v22  ;;  %631 = vmatpush.msrb.mxu0 %v570_v23  ;;  %v393_v4 = vld [vmem:[%s1386_s20 + $0x10] sm:$0xff]  ;;  %v607_v7 = vld [vmem:[#allocation2 + $0x180] sm:$0xff]  ;;  %v394_v9 = vld [vmem:[%s1386_s20 + $0x18] sm:$0xff] }
  0x3a   : > { %653 = vmatpush.msrb.mxu1 %v587_v24  ;;  %678 = vmatpush.msrb.mxu2 %v601_v25  ;;  %v391_v8 = vld [vmem:[%s1386_s20] sm:$0xff]  ;;  %v807_v11 = vld [vmem:[%s1477_s6 + $0x78] sm:$0xff]  ;;  %v392_v12 = vld [vmem:[%s1386_s20 + $0x8] sm:$0xff] }
  0x3b   : > { %700 = vmatpush.msrb.mxu3 %v618_v26  ;;  %509 = vmatmul.f32.gmra.mxu1 %v388_v27  ;;  %v575_v10 = vld [vmem:[#allocation2 + $0x80] sm:$0xff]  ;;  %v806_v13 = vld [vmem:[%s1477_s6 + $0x70] sm:$0xff]  ;;  %v805_v14 = vld [vmem:[%s1477_s6 + $0x68] sm:$0xff] }
  0x3c   : > { %632 = vmatpush.msrb.mxu0 %v569_v28  ;;  %654 = vmatpush.msrb.mxu1 %v586_v29  ;;  %v397_v15 = vld [vmem:[%s1386_s20 + $0x30] sm:$0x3]  ;;  %v804_v16 = vld [vmem:[%s1477_s6 + $0x60] sm:$0xff]  ;;  %v398_v18 = vld [vmem:[%s1386_s20 + $0x38] sm:$0x3] }
  0x3d   : > { %679 = vmatpush.msrb.mxu2 %v600_v30  ;;  %701 = vmatpush.msrb.mxu3 %v617_v31  ;;  %v395_v17 = vld [vmem:[%s1386_s20 + $0x20] sm:$0x3]  ;;  %v803_v19 = vld [vmem:[%s1477_s6 + $0x58] sm:$0xff]  ;;  %v396_v20 = vld [vmem:[%s1386_s20 + $0x28] sm:$0x3] }
  0x3e   : > { %633 = vmatpush.msrb.mxu0 %v568_v32  ;;  %655 = vmatpush.msrb.mxu1 %v585_v33  ;;  %v802_v21 = vld [vmem:[%s1477_s6 + $0x50] sm:$0xff]  ;;  %v801_v22 = vld [vmem:[%s1477_s6 + $0x48] sm:$0xff]  ;;  %v800_v23 = vld [vmem:[%s1477_s6 + $0x40] sm:$0xff] }
  0x3f   : > { %680 = vmatpush.msrb.mxu2 %v599_v34  ;;  %702 = vmatpush.msrb.mxu3 %v616_v35  ;;  %v799_v24 = vld [vmem:[%s1477_s6 + $0x38] sm:$0xff]  ;;  %v798_v25 = vld [vmem:[%s1477_s6 + $0x30] sm:$0xff]  ;;  %v797_v26 = vld [vmem:[%s1477_s6 + $0x28] sm:$0xff] }
  0x40   : > { %634 = vmatpush.msrb.mxu0 %v567_v36  ;;  %656 = vmatpush.msrb.mxu1 %v584_v37  ;;  %v796_v27 = vld [vmem:[%s1477_s6 + $0x20] sm:$0xff]  ;;  %v795_v28 = vld [vmem:[%s1477_s6 + $0x18] sm:$0xff]  ;;  %v794_v29 = vld [vmem:[%s1477_s6 + $0x10] sm:$0xff] }
  0x41   : > { %681 = vmatpush.msrb.mxu2 %v598_v38  ;;  %703 = vmatpush.msrb.mxu3 %v615_v39  ;;  %v793_v30 = vld [vmem:[%s1477_s6 + $0x8] sm:$0xff]  ;;  %v792_v31 = vld [vmem:[%s1477_s6] sm:$0xff] }
  0x42   : > { %635 = vmatpush.msrb.mxu0 %v566_v40  ;;  %657 = vmatpush.msrb.mxu1 %v583_v41  ;;  %v1047_v32 = vld [vmem:[%s1474_s3] ss:$0 sm:$0xff] }
  0x43   : > { %682 = vmatpush.msrb.mxu2 %v597_v42  ;;  %704 = vmatpush.msrb.mxu3 %v614_v43 }
  0x44   : > { %636 = vmatpush.msrb.mxu0 %v565_v44  ;;  %658 = vmatpush.msrb.mxu1 %v582_v45 }
  0x45   : > { %683 = vmatpush.msrb.mxu2 %v596_v46  ;;  %705 = vmatpush.msrb.mxu3 %v613_v47 }
  0x46   : > { %637 = vmatpush.msrb.mxu0 %v564_v48  ;;  %659 = vmatpush.msrb.mxu1 %v581_v49 }
  0x47   : > { %684 = vmatpush.msrb.mxu2 %v595_v50  ;;  %706 = vmatpush.msrb.mxu3 %v612_v51  ;;  %v1048_v51 = vld [vmem:[%s1476_s5] ss:$0 sm:$0xff] }
  0x48   : > { %638 = vmatpush.msrb.mxu0 %v563_v52  ;;  %660 = vmatpush.msrb.mxu1 %v580_v53 }
  0x49   : > { %685 = vmatpush.msrb.mxu2 %v594_v54  ;;  %707 = vmatpush.msrb.mxu3 %v611_v55 }
  0x4a   : > { %639 = vmatpush.msrb.mxu0 %v562_v56  ;;  %661 = vmatpush.msrb.mxu1 %v579_v57 }
  0x4b   : > { %686 = vmatpush.msrb.mxu2 %v593_v58  ;;  %708 = vmatpush.msrb.mxu3 %v610_v59 }
  0x4c   : > { %640 = vmatpush.msrb.mxu0 %v561_v60  ;;  %662 = vmatpush.msrb.mxu1 %v578_v61 }
  0x4d   : > { %687 = vmatpush.msrb.mxu2 %v592_v62  ;;  %709 = vmatpush.msrb.mxu3 %v609_v63 }
  0x4e   : > { %641 = vmatpush.msrb.mxu0 %v560_v0  ;;  %663 = vmatpush.msrb.mxu1 %v577_v1 }
  0x4f   : > { %688 = vmatpush.msrb.mxu2 %v591_v2  ;;  %710 = vmatpush.msrb.mxu3 %v608_v3 }
  0x50   : > { %689 = vmatmul.f32.vlgmr.msrb.gmra.mxu2 %v393_v4  ;;  %642 = vmatpush.msrb.mxu0 %v559_v5 }
  0x51   : > { %664 = vmatpush.msrb.mxu1 %v576_v6  ;;  %711 = vmatpush.msrb.mxu3 %v607_v7 }
  0x52   : > { %643 = vmatmul.f32.vlgmr.msrb.gmra.mxu0 %v391_v8  ;;  %712 = vmatmul.f32.vlgmr.msrb.gmra.mxu3 %v394_v9 }
  0x53   : > { %665 = vmatpush.msrb.mxu1 %v575_v10  ;;  %1010 = vmatpush.msra.mxu3 %v807_v11 }
  0x54   : > { %666 = vmatmul.f32.vlgmr.msrb.gmra.mxu1 %v392_v12 }
  0x55   : > { %1011 = vmatpush.msra.mxu3 %v806_v13  ;;  %808 = vmatpush.msra.mxu1 %v807_v11 }
  0x57   : > { %1012 = vmatpush.msra.mxu3 %v805_v14  ;;  %809 = vmatpush.msra.mxu1 %v806_v13 }
  0x58   : > { %692 = vmatmul.f32.gmra.mxu2 %v397_v15 }
  0x59   : > { %1013 = vmatpush.msra.mxu3 %v804_v16  ;;  %810 = vmatpush.msra.mxu1 %v805_v14 }
  0x5a   : > { %646 = vmatmul.f32.gmra.mxu0 %v395_v17  ;;  %715 = vmatmul.f32.gmra.mxu3 %v398_v18 }
  0x5b   : > { %1014 = vmatpush.msra.mxu3 %v803_v19  ;;  %811 = vmatpush.msra.mxu1 %v804_v16 }
  0x5c   : > { %669 = vmatmul.f32.gmra.mxu1 %v396_v20 }
  0x5d   : > { %1015 = vmatpush.msra.mxu3 %v802_v21  ;;  %812 = vmatpush.msra.mxu1 %v803_v19 }
  0x5f   : > { %1016 = vmatpush.msra.mxu3 %v801_v22  ;;  %813 = vmatpush.msra.mxu1 %v802_v21 }
  0x61   : > { %814 = vmatpush.msra.mxu1 %v801_v22  ;;  %1017 = vmatpush.msra.mxu3 %v800_v23 }
  0x63   : > { %815 = vmatpush.msra.mxu1 %v800_v23  ;;  %1018 = vmatpush.msra.mxu3 %v799_v24 }
  0x65   : > { %816 = vmatpush.msra.mxu1 %v799_v24  ;;  %1019 = vmatpush.msra.mxu3 %v798_v25 }
  0x67   : > { %817 = vmatpush.msra.mxu1 %v798_v25  ;;  %1020 = vmatpush.msra.mxu3 %v797_v26 }
  0x69   : > { %818 = vmatpush.msra.mxu1 %v797_v26  ;;  %1021 = vmatpush.msra.mxu3 %v796_v27 }
  0x6b   : > { %819 = vmatpush.msra.mxu1 %v796_v27  ;;  %1022 = vmatpush.msra.mxu3 %v795_v28 }
  0x6d   : > { %820 = vmatpush.msra.mxu1 %v795_v28  ;;  %1023 = vmatpush.msra.mxu3 %v794_v29 }
  0x6f   : > { %821 = vmatpush.msra.mxu1 %v794_v29  ;;  %1024 = vmatpush.msra.mxu3 %v793_v30 }
  0x71   : > { %822 = vmatpush.msra.mxu1 %v793_v30  ;;  %1025 = vmatpush.msra.mxu3 %v792_v31 }
  0x73   : > { %823 = vmatpush.msra.mxu1 %v792_v31 }
  0xab   : > { %v484_v33 = vpop.f32.mrf.mxu0 }
  0xac   : > { %v485_v34 = vadd.f32 %v1047_v32, %v484_v33 }
  0xaf   : > { %v507_v35 = vpop.f32.mrf.mxu1 }
  0xb0   : > { %v508_v36 = vadd.f32 %v507_v35, %v485_v34  ;;  %v530_v37 = vpop.f32.mrf.mxu2 }
  0xb2   : > { %v531_v38 = vadd.f32 %v530_v37, %v508_v36  ;;  %v553_v39 = vpop.f32.mrf.mxu3 }
  0xb4   : > { %v554_v40 = vadd.f32 %v553_v39, %v531_v38 }
  0xb5   : > { %v487_v41 = vpop.f32.mrf.mxu0 }
  0xb6   : > { %v488_v42 = vadd.f32 %v1047_v32, %v487_v41  ;;  %824 = vmatmul.f32.vlgmr.msra.gmra.mxu1 %v554_v40 }
  0xb8   : > { %v510_v43 = vpop.f32.mrf.mxu1 }
  0xb9   : > { %v511_v44 = vadd.f32 %v510_v43, %v488_v42  ;;  %v533_v45 = vpop.f32.mrf.mxu2  ;;  %v1049_v42 = vld [vmem:[%s1478_s7] ss:$0 sm:$0xff] }
  0xbb   : > { %v534_v46 = vadd.f32 %v533_v45, %v511_v44 }
  0xbc   : > { %v556_v47 = vpop.f32.mrf.mxu3 }
  0xbd   : > { %v557_v48 = vadd.f32 %v556_v47, %v534_v46 }
  0xbf   : > { %827 = vmatmul.f32.vlgmr.msra.gmra.mxu3 %v557_v48 }
  0xcf   : > { %v644_v49 = vpop.f32.mrf.mxu0 }
  0xd0   : > { %v645_v54 = vadd.f32 %v1048_v51, %v644_v49 }
  0xd1   : > { %v667_v50 = vpop.f32.mrf.mxu1 }
  0xd2   : > { %v668_v58 = vadd.f32 %v667_v50, %v645_v54 }
  0xd3   : > { %v690_v52 = vpop.f32.mrf.mxu2 }
  0xd4   : > { %v691_v63 = vadd.f32 %v690_v52, %v668_v58 }
  0xd5   : > { %v713_v53 = vpop.f32.mrf.mxu3 }
  0xd6   : > { %v714_v1 = vadd.f32 %v713_v53, %v691_v63 }
  0xd7   : > { %v647_v55 = vpop.f32.mrf.mxu0 }
  0xd8   : > { %v648_v56 = vadd.f32 %v1048_v51, %v647_v55 }
  0xd9   : > { %v670_v57 = vpop.f32.mrf.mxu1 }
  0xda   : > { %v671_v59 = vadd.f32 %v670_v57, %v648_v56 }
  0xdb   : > { %v693_v60 = vpop.f32.mrf.mxu2 }
  0xdc   : > { %v694_v61 = vadd.f32 %v693_v60, %v671_v59 }
  0xdd   : > { %v716_v62 = vpop.f32.mrf.mxu3 }
  0xde   : > { %v717_v0 = vadd.f32 %v716_v62, %v694_v61 }
  0xe0   : > { %733 = vmatpush.xpose.msra.mxu0 %v717_v0 }
  0xe4   : > { %734 = vmatpush.xpose.msra.mxu0 %v714_v1 }
  0xe7   : > { %735 = vmatmul.f32.vlgmr.msra.gmra.mxu0 %v554_v40 }
  0xef   : > { %738 = vmatmul.f32.gmra.mxu0 %v557_v48 }
 0x133   : > { %v825_v3 = vpop.f32.mrf.mxu1 }
 0x142   : > { %v828_v2 = vpop.f32.mrf.mxu3 }
 0x143   : > { %1001 = vmatpush.msk.msra.mxu2 %vm841_vm0, %v828_v2 }
 0x145   : > { %860 = vmatpush.msra.mxu2 %v825_v3 }
 0x164   : > { %v736_v4 = vpop.f32.mrf.mxu0 }
 0x165   : > { %v743_v5 = vsel %vm742_vm1, %v736_v4, -inf }
 0x166   : > { %744 = vmax.xlane.f32.xlu0 %v743_v5 }
 0x16c   : > { %v739_v6 = vpop.f32.mrf.mxu0 }
 0x16d   : > { %v747_v7 = vsel %vm746_vm2, %v739_v6, -inf }
 0x16e   : > { %748 = vmax.xlane.f32.xlu0 %v747_v7 }
 0x1d9   : > { %v745_v8 = vpop.xlane.xlu0 %744 }
 0x1da   : > { %v750_v9 = vsub.f32 %v736_v4, %v745_v8 }
 0x1dc   : > { %v752_v10 = vmul.f32 1.442695, %v750_v9 }
 0x1de   : > { %1050 = vpow2.f32 %v752_v10 }
 0x1e1   : > { %v749_v11 = vpop.xlane.xlu0 %748 }
 0x1e2   : > { %v751_v12 = vsub.f32 %v739_v6, %v749_v11 }
 0x1e4   : > { %v1051_v13 = vpop.eup %1050  ;;  %v754_v14 = vmul.f32 1.442695, %v751_v12 }
 0x1e5   : > { %v756_v15 = vsel %vm742_vm1, %v1051_v13, 0.0 }
 0x1e6   : > { %1052 = vpow2.f32 %v754_v14  ;;  %757 = vadd.xlane.f32.xlu1 %v756_v15 }
 0x1ec   : > { %v1053_v16 = vpop.eup %1052 }
 0x1ed   : > { %v759_v17 = vsel %vm746_vm2, %v1053_v16, 0.0 }
 0x1ee   : > { %760 = vadd.xlane.f32.xlu1 %v759_v17 }
 0x259   : > { %v758_v18 = vpop.xlane.xlu1 %757 }
 0x25a   : > { %1054 = vrcp.f32 %v758_v18  ;;  %v773_v23 = vand.u32 2147483648, %v758_v18  ;;  %v771_v25 = vand.u32 2147483647, %v758_v18  ;;  %vm767_vm4 = vweird.f32 %v758_v18 }
 0x25c   : > { %v774_v28 = vor.u32 1.1754944e-38, %v773_v23  ;;  %vm772_vm6 = vcmp.eq.f32.partialorder %v771_v25, 8.507059e+37 }
 0x260   : > { %v1055_v19 = vpop.eup %1054 }
 0x261   : > { %v763_v20 = vmul.f32 %v1055_v19, %v758_v18  ;;  %v761_v21 = vpop.xlane.xlu1 %760  ;;  %vm768_vm3 = vweird.f32 %v1055_v19 }
 0x262   : > { %1056 = vrcp.f32 %v761_v21  ;;  %vm769_vm5 = vmor %vm767_vm4, %vm768_vm3  ;;  %v787_v34 = vand.u32 2147483648, %v761_v21  ;;  %v785_v36 = vand.u32 2147483647, %v761_v21  ;;  %vm781_vm8 = vweird.f32 %v761_v21 }
 0x263   : > { %v764_v22 = vsub.f32 1.0, %v763_v20 }
 0x264   : > { %v788_v38 = vor.u32 1.1754944e-38, %v787_v34  ;;  %vm786_vm10 = vcmp.eq.f32.partialorder %v785_v36, 8.507059e+37 }
 0x265   : > { %v765_v24 = vmul.f32 %v1055_v19, %v764_v22 }
 0x267   : > { %v766_v26 = vadd.f32 %v1055_v19, %v765_v24 }
 0x268   : > { %v1057_v27 = vpop.eup %1056 }
 0x269   : > { %v770_v29 = vsel %vm769_vm5, %v1055_v19, %v766_v26  ;;  %v777_v30 = vmul.f32 %v1057_v27, %v761_v21  ;;  %vm782_vm7 = vweird.f32 %v1057_v27 }
 0x26a   : > { %v775_v31 = vsel %vm772_vm6, %v774_v28, %v770_v29  ;;  %vm783_vm9 = vmor %vm781_vm8, %vm782_vm7 }
 0x26b   : > { %v778_v32 = vsub.f32 1.0, %v777_v30  ;;  %v790_v33 = vmul.f32 %v1051_v13, %v775_v31 }
 0x26d   : > { %v779_v35 = vmul.f32 %v1057_v27, %v778_v32  ;;  %1002 = vmatmul.msk.f32.vlgmr.msra.gmra.mxu2 %vm742_vm1, %v790_v33  ;;  %872 = vst.msk [vmem:[%s382_s21] sm:$0xff] %vm742_vm1, %v790_v33 }
 0x26f   : > { %v780_v37 = vadd.f32 %v1057_v27, %v779_v35 }
 0x271   : > { %v784_v39 = vsel %vm783_vm9, %v1057_v27, %v780_v37 }
 0x272   : > { %v789_v40 = vsel %vm786_vm10, %v788_v38, %v784_v39 }
 0x273   : > { %v791_v41 = vmul.f32 %v1053_v16, %v789_v40 }
 0x275   : > { %1003 = vmatmul.msk.f32.gmra.mxu2 %vm742_vm1, %v791_v41  ;;  %873 = vst.msk [vmem:[%s382_s21 + $0x8] sm:$0x3] %vm746_vm2, %v791_v41 }
 0x2f0   : > { %v862_v43 = vpop.f32.mrf.mxu2 }
 0x2f1   : > { %v863_v44 = vadd.f32 %v1049_v42, %v862_v43 }
 0x2f3   : > { %869 = vst.msk [vmem:[%s377_s25] sm:$0xff] %vm868_vm11, %v863_v44 }
 0x2f8   : > { %v865_v45 = vpop.f32.mrf.mxu2 }
 0x2f9   : > { %v866_v46 = vadd.f32 %v1049_v42, %v865_v45 }
 0x2fb   : > { %871 = vst.msk [vmem:[%s377_s25 + $0x8] sm:$0x3] %vm870_vm12, %v866_v46 }
 0x2fc PF: > { %s21_s30 = sadd.s32 1, %s1098_s30  }
 0x2fd   : > { %p18_p7 = scmp.ge.s32.totalorder %s21_s30, 4  }
 0x2ff   :  { %20 = sbr.rel (!%p18_p7) target bundleno = 1 (0x1), region = 102 }
 0x304   :  { %911 = vsyncpa [#allocation3], 1 }
 0x305   :  { %913 = vsyncpa [#allocation3 + $0x1], 1 }

</bundles_post_ra>
